<compile_context>
chip_gen: v5e
topology: v5e:2x2
jax: 0.10.0
libtpu: 0.0.40
codegen_flags: <defaults>
</compile_context>

<pallas_src>
import functools

import jax
import jax.numpy as jnp
from jax.experimental import pallas as pl
from jax.experimental.pallas import tpu as pltpu


_EPS = 1e-12              # matches torch.nn.functional.normalize default eps
_LANES = 128              # TPU lane width
_TILE_ROWS_F32 = 4096     # (4096, 128) f32 tile = 2 MiB per input per buffer
# Default dispatch threshold: anything that fits a single tile goes to the
# fused pure-JAX path (Pallas is only worth it when the grid actually streams).
_SMALL_N_ELEMS = _TILE_ROWS_F32 * _LANES


def _plcc_moments_kernel(n_ref, shift_ref, x_ref, y_ref, out_ref,
                         acc_sx, acc_sy, acc_sxx, acc_syy, acc_sxy,
                         *, tile_rows):
    """Accumulate shifted raw moments per tile; finalize PLCC loss on last step.

    n_ref:     (1,)  int32 SMEM -- number of valid (unpadded) elements.
    shift_ref: (2,)  f32   SMEM -- [shift_x, shift_y] (first elements of x, y).
    x_ref/y_ref: (tile_rows, 128) blocks.  The padded tail holds exactly the
      shift value, so after subtraction it contributes 0 to every sum.
    acc_*:     (8, 128) f32 VMEM partial accumulators, persistent across grid.
    """
    step = pl.program_id(0)

    @pl.when(step == 0)
    def _init():
        acc_sx[...] = jnp.zeros_like(acc_sx)
        acc_sy[...] = jnp.zeros_like(acc_sy)
        acc_sxx[...] = jnp.zeros_like(acc_sxx)
        acc_syy[...] = jnp.zeros_like(acc_syy)
        acc_sxy[...] = jnp.zeros_like(acc_sxy)

    # Cast to f32 on the VPU and shift by the first element for conditioning.
    x = x_ref[...].astype(jnp.float32) - shift_ref[0]
    y = y_ref[...].astype(jnp.float32) - shift_ref[1]

    groups = tile_rows // 8
    # (groups, 8, 128) view matches the native (8, 128) vreg tiling, so the
    # axis-0 reduction is plain VALU vreg adds (no per-step XLU work).
    xr = x.reshape(groups, 8, _LANES)
    yr = y.reshape(groups, 8, _LANES)

    acc_sx[...] += jnp.sum(xr, axis=0)
    acc_sy[...] += jnp.sum(yr, axis=0)
    acc_sxx[...] += jnp.sum(xr * xr, axis=0)
    acc_syy[...] += jnp.sum(yr * yr, axis=0)
    acc_sxy[...] += jnp.sum(xr * yr, axis=0)

    @pl.when(step == pl.num_programs(0) - 1)
    def _finalize():
        nf = n_ref[0].astype(jnp.float32)
        sx = jnp.sum(acc_sx[...])
        sy = jnp.sum(acc_sy[...])
        sxx = jnp.sum(acc_sxx[...])
        syy = jnp.sum(acc_syy[...])
        sxy = jnp.sum(acc_sxy[...])

        # Centered second moments of the *shifted* data (shift-invariant).
        vxx = sxx - sx * sx / nf           # = sum (x - mean_x)^2
        vyy = syy - sy * sy / nf           # = sum (y - mean_y)^2
        vxy = sxy - sx * sy / nf           # = sum (x - mean_x)(y - mean_y)

        nx = jnp.maximum(jnp.sqrt(jnp.maximum(vxx, 0.0)), _EPS)
        ny = jnp.maximum(jnp.sqrt(jnp.maximum(vyy, 0.0)), _EPS)

        # Identical to sum((vx/nx)*(vy/ny)) in the PyTorch reference.
        corr = vxy / (nx * ny)
        loss = (1.0 - corr) * 0.5
        out_ref[...] = jnp.full((1, 1), loss, dtype=out_ref.dtype)


def _plcc_loss_jax_core(pred, target):
    """Fused pure-JAX PLCC core (two-pass, mirrors the PyTorch math)."""
    p = jnp.reshape(pred, (-1,)).astype(jnp.float32)
    t = jnp.reshape(target, (-1,)).astype(jnp.float32)
    vx = p - jnp.mean(p)
    vy = t - jnp.mean(t)
    nx = jnp.maximum(jnp.sqrt(jnp.sum(vx * vx)), _EPS)
    ny = jnp.maximum(jnp.sqrt(jnp.sum(vy * vy)), _EPS)
    return (1.0 - jnp.sum((vx / nx) * (vy / ny))) * 0.5


def plcc_loss_pallas(pred, target, loss_weight=1.0, *,
                     tile_rows=None, small_n_threshold=_SMALL_N_ELEMS):
    """Pallas implementation of PLCCLoss.forward.

    Args:
      pred:   (N, 1) array (any float dtype).
      target: (N, 1) array.
      tile_rows: optional override for the (tile_rows, 128) streaming tile.
      small_n_threshold: batches with N <= this use the fused pure-JAX path.
    Returns:
      scalar float32 loss (times loss_weight).
    """
    n = pred.shape[0]

    if n <= 1:
        # batch_size == 1 fallback: plain L1 loss, fused in XLA (no Pallas).
        p = pred.astype(jnp.float32)
        t = target.astype(jnp.float32)
        return loss_weight * jnp.mean(jnp.abs(p - t))

    if n <= small_n_threshold:
        # Typical small-batch use case: fused XLA path avoids launch/pad cost.
        return loss_weight * _plcc_loss_jax_core(pred, target)

    itemsize = pred.dtype.itemsize
    if tile_rows is None:
        # 16-bit inputs: double the rows so per-step DMA bytes stay comparable.
        tile_rows = _TILE_ROWS_F32 * (2 if itemsize <= 2 else 1)
    assert tile_rows % 8 == 0, "tile_rows must be a multiple of 8"

    pred_flat = jnp.reshape(pred, (-1,))
    target_flat = jnp.reshape(target, (-1,))
    shift_x = pred_flat[0]
    shift_y = target_flat[0]

    # Lane/sublane-dense packing: (rows_p, 128).
    rows = -(-n // _LANES)
    if rows <= tile_rows:
        rows_p = -(-rows // 8) * 8
        tile_rows_eff = max(rows_p, 8)
        rows_p = tile_rows_eff
    else:
        rows_p = -(-rows // tile_rows) * tile_rows
        tile_rows_eff = tile_rows
    n_pad = rows_p * _LANES
    grid = (rows_p // tile_rows_eff,)

    def _pack(v, fill):
        # Pad with the per-array shift value: after the in-kernel shift
        # subtraction the padded elements are exactly zero, so they contribute
        # nothing to any accumulated moment (no in-kernel masking needed).
        pad_len = n_pad - n
        if pad_len:
            v = jnp.concatenate(
                [v, jnp.full((pad_len,), fill, dtype=v.dtype)])
        return v.reshape(rows_p, _LANES)

    x2 = _pack(pred_flat, shift_x)
    y2 = _pack(target_flat, shift_y)

    n_arr = jnp.array([n], dtype=jnp.int32)
    shifts = jnp.stack([shift_x, shift_y]).astype(jnp.float32)

    kernel = functools.partial(_plcc_moments_kernel, tile_rows=tile_rows_eff)

    out = pl.pallas_call(
        kernel,
        out_shape=jax.ShapeDtypeStruct((1, 1), jnp.float32),
        grid=grid,
        in_specs=[
            pl.BlockSpec(memory_space=pltpu.MemorySpace.SMEM),   # n_valid
            pl.BlockSpec(memory_space=pltpu.MemorySpace.SMEM),   # shifts
            pl.BlockSpec((tile_rows_eff, _LANES), lambda i: (i, 0)),
            pl.BlockSpec((tile_rows_eff, _LANES), lambda i: (i, 0)),
        ],
        out_specs=pl.BlockSpec((1, 1), lambda i: (0, 0)),
        scratch_shapes=[pltpu.VMEM((8, _LANES), jnp.float32)] * 5,
        compiler_params=pltpu.CompilerParams(
            dimension_semantics=("arbitrary",),
            # Let XLA fuse the pad/reshape producers into the input DMA
            # (scalar SMEM operands excluded).
            allow_input_fusion=[False, False, True, True],
            # Larger tiles than the scoped-VMEM default on v5e (16 MiB) needs;
            # well under v7x's 64 MiB physical VMEM.
            vmem_limit_bytes=48 * 1024 * 1024,
        ),
    )(n_arr, shifts, x2, y2)

    return loss_weight * out[0, 0]


def plcc_loss_ref(pred, target, loss_weight=1.0):
    """Pure-JAX reference mirroring the PyTorch semantics exactly."""
    n = pred.shape[0]
    pred = pred.astype(jnp.float32)
    target = target.astype(jnp.float32)
    if n > 1:
        loss = _plcc_loss_jax_core(pred, target)
    else:
        loss = jnp.mean(jnp.abs(pred - target))
    return loss_weight * loss


if __name__ == "__main__":
    key = jax.random.PRNGKey(0)
    k1, k2, k3, k4 = jax.random.split(key, 4)
    loss_weight = 1.0  # PLCCLoss(loss_weight=1.0)

    # 1) Typical module usage: small (N, 1) batch -> fused JAX fast path.
    N = 8
    pred = jax.random.normal(k1, (N, 1), dtype=jnp.float32)
    target = jax.random.normal(k2, (N, 1), dtype=jnp.float32)
    out1 = jax.block_until_ready(plcc_loss_pallas(pred, target, loss_weight))
    ref1 = plcc_loss_ref(pred, target, loss_weight)
    assert jnp.allclose(out1, ref1, atol=1e-5, rtol=1e-5), (out1, ref1)

    # 2) batch_size == 1 -> L1 fallback.
    out2 = jax.block_until_ready(
        plcc_loss_pallas(pred[:1], target[:1], loss_weight))
    ref2 = plcc_loss_ref(pred[:1], target[:1], loss_weight)
    assert jnp.allclose(out2, ref2, atol=1e-6), (out2, ref2)

    # 3) Pallas moments kernel, single-block path: ragged N (not a multiple of
    #    128) with a non-zero mean to exercise the shift + shift-valued pad.
    N3 = 300
    p3 = 3.0 + jax.random.normal(k3, (N3, 1), dtype=jnp.float32)
    t3 = 0.5 * p3 + jax.random.normal(k4, (N3, 1), dtype=jnp.float32)
    out3 = jax.block_until_ready(
        plcc_loss_pallas(p3, t3, loss_weight, small_n_threshold=0))
    ref3 = plcc_loss_ref(p3, t3, loss_weight)
    assert jnp.allclose(out3, ref3, atol=1e-5, rtol=1e-5), (out3, ref3)

    # 4) Pallas moments kernel, multi-step grid accumulation (small tile_rows
    #    so several grid steps run without needing a huge input).
    k5, k6 = jax.random.split(k4)
    N4 = 5000
    p4 = jax.random.normal(k5, (N4, 1), dtype=jnp.float32)
    t4 = 0.3 * p4 + jax.random.normal(k6, (N4, 1), dtype=jnp.float32)
    out4 = jax.block_until_ready(
        plcc_loss_pallas(p4, t4, loss_weight, tile_rows=8, small_n_threshold=0))
    ref4 = plcc_loss_ref(p4, t4, loss_weight)
    assert jnp.allclose(out4, ref4, atol=1e-5, rtol=1e-5), (out4, ref4)

    print("KERNEL_OK")
</pallas_src>

<mosaic_0001>
module attributes {stable_mosaic.version = 11 : i64} {
  func.func @_plcc_moments_kernel(%arg0: i32, %arg1: memref<1xi32, #tpu.memory_space<smem>>, %arg2: memref<2xf32, #tpu.memory_space<smem>>, %arg3: memref<8x128xf32, #tpu.memory_space<vmem>>, %arg4: memref<8x128xf32, #tpu.memory_space<vmem>>, %arg5: memref<1x1xf32, #tpu.memory_space<vmem>>, %arg6: memref<8x128xf32, #tpu.memory_space<vmem>>, %arg7: memref<8x128xf32, #tpu.memory_space<vmem>>, %arg8: memref<8x128xf32, #tpu.memory_space<vmem>>, %arg9: memref<8x128xf32, #tpu.memory_space<vmem>>, %arg10: memref<8x128xf32, #tpu.memory_space<vmem>>) attributes {dimension_semantics = [#tpu.dimension_semantics<arbitrary>], iteration_bounds = array<i64: 1>, scalar_prefetch = 0 : i64, scratch_operands = 5 : i64, tpu.core_type = #tpu.core_type<tc>, window_params = [{transform_indices = @transform_0, window_bounds = array<i64: 1>}, {transform_indices = @transform_1, window_bounds = array<i64: 2>}, {transform_indices = @transform_2, window_bounds = array<i64: 8, 128>}, {transform_indices = @transform_3, window_bounds = array<i64: 8, 128>}, {pipeline_mode = #tpu.pipeline_mode<synchronous>, transform_indices = @transform_4, window_bounds = array<i64: 1, 1>}]} {
    %c0_i32 = arith.constant 0 : i32
    %0 = arith.cmpi eq, %arg0, %c0_i32 : i32
    %1 = arith.extui %0 : i1 to i32
    %c0_i32_0 = arith.constant 0 : i32
    %2 = arith.cmpi ne, %1, %c0_i32_0 : i32
    scf.if %2 {
      %cst_31 = arith.constant 0.000000e+00 : f32
      %39 = vector.broadcast %cst_31 : f32 to vector<8x128xf32>
      %c0_32 = arith.constant 0 : index
      %c0_33 = arith.constant 0 : index
      %40 = vector.load %arg6[%c0_32, %c0_33] : memref<8x128xf32, #tpu.memory_space<vmem>>, vector<8x128xf32>
      tpu.vector_store %arg6[%c0_32, %c0_33], %39 {strides = array<i32>} : memref<8x128xf32, #tpu.memory_space<vmem>>, vector<8x128xf32>,
      %cst_34 = arith.constant 0.000000e+00 : f32
      %41 = vector.broadcast %cst_34 : f32 to vector<8x128xf32>
      %c0_35 = arith.constant 0 : index
      %c0_36 = arith.constant 0 : index
      %42 = vector.load %arg7[%c0_35, %c0_36] : memref<8x128xf32, #tpu.memory_space<vmem>>, vector<8x128xf32>
      tpu.vector_store %arg7[%c0_35, %c0_36], %41 {strides = array<i32>} : memref<8x128xf32, #tpu.memory_space<vmem>>, vector<8x128xf32>,
      %cst_37 = arith.constant 0.000000e+00 : f32
      %43 = vector.broadcast %cst_37 : f32 to vector<8x128xf32>
      %c0_38 = arith.constant 0 : index
      %c0_39 = arith.constant 0 : index
      %44 = vector.load %arg8[%c0_38, %c0_39] : memref<8x128xf32, #tpu.memory_space<vmem>>, vector<8x128xf32>
      tpu.vector_store %arg8[%c0_38, %c0_39], %43 {strides = array<i32>} : memref<8x128xf32, #tpu.memory_space<vmem>>, vector<8x128xf32>,
      %cst_40 = arith.constant 0.000000e+00 : f32
      %45 = vector.broadcast %cst_40 : f32 to vector<8x128xf32>
      %c0_41 = arith.constant 0 : index
      %c0_42 = arith.constant 0 : index
      %46 = vector.load %arg9[%c0_41, %c0_42] : memref<8x128xf32, #tpu.memory_space<vmem>>, vector<8x128xf32>
      tpu.vector_store %arg9[%c0_41, %c0_42], %45 {strides = array<i32>} : memref<8x128xf32, #tpu.memory_space<vmem>>, vector<8x128xf32>,
      %cst_43 = arith.constant 0.000000e+00 : f32
      %47 = vector.broadcast %cst_43 : f32 to vector<8x128xf32>
      %c0_44 = arith.constant 0 : index
      %c0_45 = arith.constant 0 : index
      %48 = vector.load %arg10[%c0_44, %c0_45] : memref<8x128xf32, #tpu.memory_space<vmem>>, vector<8x128xf32>
      tpu.vector_store %arg10[%c0_44, %c0_45], %47 {strides = array<i32>} : memref<8x128xf32, #tpu.memory_space<vmem>>, vector<8x128xf32>,
    } else {
    }
    %c0 = arith.constant 0 : index
    %c0_1 = arith.constant 0 : index
    %3 = vector.load %arg3[%c0, %c0_1] : memref<8x128xf32, #tpu.memory_space<vmem>>, vector<8x128xf32>
    %c0_2 = arith.constant 0 : index
    %4 = memref.load %arg2[%c0_2] : memref<2xf32, #tpu.memory_space<smem>>
    %5 = vector.broadcast %4 : f32 to vector<8x128xf32>
    %6 = arith.subf %3, %5 : vector<8x128xf32>
    %c0_3 = arith.constant 0 : index
    %c0_4 = arith.constant 0 : index
    %7 = vector.load %arg4[%c0_3, %c0_4] : memref<8x128xf32, #tpu.memory_space<vmem>>, vector<8x128xf32>
    %c1 = arith.constant 1 : index
    %8 = memref.load %arg2[%c1] : memref<2xf32, #tpu.memory_space<smem>>
    %9 = vector.broadcast %8 : f32 to vector<8x128xf32>
    %10 = arith.subf %7, %9 : vector<8x128xf32>
    %11 = vector.shape_cast %6 : vector<8x128xf32> to vector<1x8x128xf32>
    %12 = vector.shape_cast %10 : vector<8x128xf32> to vector<1x8x128xf32>
    %c0_5 = arith.constant 0 : index
    %c0_6 = arith.constant 0 : index
    %13 = vector.load %arg6[%c0_5, %c0_6] : memref<8x128xf32, #tpu.memory_space<vmem>>, vector<8x128xf32>
    %cst = arith.constant dense<0.000000e+00> : vector<8x128xf32>
    %14 = vector.multi_reduction <add>, %11, %cst [0] : vector<1x8x128xf32> to vector<8x128xf32>
    %15 = arith.addf %13, %14 : vector<8x128xf32>
    %c0_7 = arith.constant 0 : index
    %c0_8 = arith.constant 0 : index
    %16 = vector.load %arg6[%c0_7, %c0_8] : memref<8x128xf32, #tpu.memory_space<vmem>>, vector<8x128xf32>
    tpu.vector_store %arg6[%c0_7, %c0_8], %15 {strides = array<i32>} : memref<8x128xf32, #tpu.memory_space<vmem>>, vector<8x128xf32>,
    %c0_9 = arith.constant 0 : index
    %c0_10 = arith.constant 0 : index
    %17 = vector.load %arg7[%c0_9, %c0_10] : memref<8x128xf32, #tpu.memory_space<vmem>>, vector<8x128xf32>
    %cst_11 = arith.constant dense<0.000000e+00> : vector<8x128xf32>
    %18 = vector.multi_reduction <add>, %12, %cst_11 [0] : vector<1x8x128xf32> to vector<8x128xf32>
    %19 = arith.addf %17, %18 : vector<8x128xf32>
    %c0_12 = arith.constant 0 : index
    %c0_13 = arith.constant 0 : index
    %20 = vector.load %arg7[%c0_12, %c0_13] : memref<8x128xf32, #tpu.memory_space<vmem>>, vector<8x128xf32>
    tpu.vector_store %arg7[%c0_12, %c0_13], %19 {strides = array<i32>} : memref<8x128xf32, #tpu.memory_space<vmem>>, vector<8x128xf32>,
    %c0_14 = arith.constant 0 : index
    %c0_15 = arith.constant 0 : index
    %21 = vector.load %arg8[%c0_14, %c0_15] : memref<8x128xf32, #tpu.memory_space<vmem>>, vector<8x128xf32>
    %22 = arith.mulf %11, %11 : vector<1x8x128xf32>
    %cst_16 = arith.constant dense<0.000000e+00> : vector<8x128xf32>
    %23 = vector.multi_reduction <add>, %22, %cst_16 [0] : vector<1x8x128xf32> to vector<8x128xf32>
    %24 = arith.addf %21, %23 : vector<8x128xf32>
    %c0_17 = arith.constant 0 : index
    %c0_18 = arith.constant 0 : index
    %25 = vector.load %arg8[%c0_17, %c0_18] : memref<8x128xf32, #tpu.memory_space<vmem>>, vector<8x128xf32>
    tpu.vector_store %arg8[%c0_17, %c0_18], %24 {strides = array<i32>} : memref<8x128xf32, #tpu.memory_space<vmem>>, vector<8x128xf32>,
    %c0_19 = arith.constant 0 : index
    %c0_20 = arith.constant 0 : index
    %26 = vector.load %arg9[%c0_19, %c0_20] : memref<8x128xf32, #tpu.memory_space<vmem>>, vector<8x128xf32>
    %27 = arith.mulf %12, %12 : vector<1x8x128xf32>
    %cst_21 = arith.constant dense<0.000000e+00> : vector<8x128xf32>
    %28 = vector.multi_reduction <add>, %27, %cst_21 [0] : vector<1x8x128xf32> to vector<8x128xf32>
    %29 = arith.addf %26, %28 : vector<8x128xf32>
    %c0_22 = arith.constant 0 : index
    %c0_23 = arith.constant 0 : index
    %30 = vector.load %arg9[%c0_22, %c0_23] : memref<8x128xf32, #tpu.memory_space<vmem>>, vector<8x128xf32>
    tpu.vector_store %arg9[%c0_22, %c0_23], %29 {strides = array<i32>} : memref<8x128xf32, #tpu.memory_space<vmem>>, vector<8x128xf32>,
    %c0_24 = arith.constant 0 : index
    %c0_25 = arith.constant 0 : index
    %31 = vector.load %arg10[%c0_24, %c0_25] : memref<8x128xf32, #tpu.memory_space<vmem>>, vector<8x128xf32>
    %32 = arith.mulf %11, %12 : vector<1x8x128xf32>
    %cst_26 = arith.constant dense<0.000000e+00> : vector<8x128xf32>
    %33 = vector.multi_reduction <add>, %32, %cst_26 [0] : vector<1x8x128xf32> to vector<8x128xf32>
    %34 = arith.addf %31, %33 : vector<8x128xf32>
    %c0_27 = arith.constant 0 : index
    %c0_28 = arith.constant 0 : index
    %35 = vector.load %arg10[%c0_27, %c0_28] : memref<8x128xf32, #tpu.memory_space<vmem>>, vector<8x128xf32>
    tpu.vector_store %arg10[%c0_27, %c0_28], %34 {strides = array<i32>} : memref<8x128xf32, #tpu.memory_space<vmem>>, vector<8x128xf32>,
    %c0_i32_29 = arith.constant 0 : i32
    %36 = arith.cmpi eq, %arg0, %c0_i32_29 : i32
    %37 = arith.extui %36 : i1 to i32
    %c0_i32_30 = arith.constant 0 : i32
    %38 = arith.cmpi ne, %37, %c0_i32_30 : i32
    scf.if %38 {
      %c0_31 = arith.constant 0 : index
      %39 = memref.load %arg1[%c0_31] : memref<1xi32, #tpu.memory_space<smem>>
      %40 = arith.sitofp %39 : i32 to f32
      %c0_32 = arith.constant 0 : index
      %c0_33 = arith.constant 0 : index
      %41 = vector.load %arg6[%c0_32, %c0_33] : memref<8x128xf32, #tpu.memory_space<vmem>>, vector<8x128xf32>
      %42 = vector.shape_cast %41 : vector<8x128xf32> to vector<1x8x128xf32>
      %cst_34 = arith.constant dense<0.000000e+00> : vector<1xf32>
      %43 = vector.multi_reduction <add>, %42, %cst_34 [1, 2] : vector<1x8x128xf32> to vector<1xf32>
      %44 = vector.shape_cast %43 : vector<1xf32> to vector<1x1x1xf32>
      %45 = vector.extract %44[0, 0, 0] : f32 from vector<1x1x1xf32>
      %c0_35 = arith.constant 0 : index
      %c0_36 = arith.constant 0 : index
      %46 = vector.load %arg7[%c0_35, %c0_36] : memref<8x128xf32, #tpu.memory_space<vmem>>, vector<8x128xf32>
      %47 = vector.shape_cast %46 : vector<8x128xf32> to vector<1x8x128xf32>
      %cst_37 = arith.constant dense<0.000000e+00> : vector<1xf32>
      %48 = vector.multi_reduction <add>, %47, %cst_37 [1, 2] : vector<1x8x128xf32> to vector<1xf32>
      %49 = vector.shape_cast %48 : vector<1xf32> to vector<1x1x1xf32>
      %50 = vector.extract %49[0, 0, 0] : f32 from vector<1x1x1xf32>
      %c0_38 = arith.constant 0 : index
      %c0_39 = arith.constant 0 : index
      %51 = vector.load %arg8[%c0_38, %c0_39] : memref<8x128xf32, #tpu.memory_space<vmem>>, vector<8x128xf32>
      %52 = vector.shape_cast %51 : vector<8x128xf32> to vector<1x8x128xf32>
      %cst_40 = arith.constant dense<0.000000e+00> : vector<1xf32>
      %53 = vector.multi_reduction <add>, %52, %cst_40 [1, 2] : vector<1x8x128xf32> to vector<1xf32>
      %54 = vector.shape_cast %53 : vector<1xf32> to vector<1x1x1xf32>
      %55 = vector.extract %54[0, 0, 0] : f32 from vector<1x1x1xf32>
      %c0_41 = arith.constant 0 : index
      %c0_42 = arith.constant 0 : index
      %56 = vector.load %arg9[%c0_41, %c0_42] : memref<8x128xf32, #tpu.memory_space<vmem>>, vector<8x128xf32>
      %57 = vector.shape_cast %56 : vector<8x128xf32> to vector<1x8x128xf32>
      %cst_43 = arith.constant dense<0.000000e+00> : vector<1xf32>
      %58 = vector.multi_reduction <add>, %57, %cst_43 [1, 2] : vector<1x8x128xf32> to vector<1xf32>
      %59 = vector.shape_cast %58 : vector<1xf32> to vector<1x1x1xf32>
      %60 = vector.extract %59[0, 0, 0] : f32 from vector<1x1x1xf32>
      %c0_44 = arith.constant 0 : index
      %c0_45 = arith.constant 0 : index
      %61 = vector.load %arg10[%c0_44, %c0_45] : memref<8x128xf32, #tpu.memory_space<vmem>>, vector<8x128xf32>
      %62 = vector.shape_cast %61 : vector<8x128xf32> to vector<1x8x128xf32>
      %cst_46 = arith.constant dense<0.000000e+00> : vector<1xf32>
      %63 = vector.multi_reduction <add>, %62, %cst_46 [1, 2] : vector<1x8x128xf32> to vector<1xf32>
      %64 = vector.shape_cast %63 : vector<1xf32> to vector<1x1x1xf32>
      %65 = vector.extract %64[0, 0, 0] : f32 from vector<1x1x1xf32>
      %66 = arith.mulf %45, %45 : f32
      %67 = arith.divf %66, %40 : f32
      %68 = arith.subf %55, %67 : f32
      %69 = arith.mulf %50, %50 : f32
      %70 = arith.divf %69, %40 : f32
      %71 = arith.subf %60, %70 : f32
      %72 = arith.mulf %45, %50 : f32
      %73 = arith.divf %72, %40 : f32
      %74 = arith.subf %65, %73 : f32
      %cst_47 = arith.constant 0.000000e+00 : f32
      %75 = arith.maximumf %68, %cst_47 : f32
      %76 = math.sqrt %75 : f32
      %cst_48 = arith.constant 9.99999996E-13 : f32
      %77 = arith.maximumf %76, %cst_48 : f32
      %cst_49 = arith.constant 0.000000e+00 : f32
      %78 = arith.maximumf %71, %cst_49 : f32
      %79 = math.sqrt %78 : f32
      %cst_50 = arith.constant 9.99999996E-13 : f32
      %80 = arith.maximumf %79, %cst_50 : f32
      %81 = arith.mulf %77, %80 : f32
      %82 = arith.divf %74, %81 : f32
      %cst_51 = arith.constant 1.000000e+00 : f32
      %83 = arith.subf %cst_51, %82 : f32
      %cst_52 = arith.constant 5.000000e-01 : f32
      %84 = arith.mulf %83, %cst_52 : f32
      %85 = vector.broadcast %84 : f32 to vector<1x1xf32>
      %c0_53 = arith.constant 0 : index
      %c0_54 = arith.constant 0 : index
      %86 = vector.load %arg5[%c0_53, %c0_54] : memref<1x1xf32, #tpu.memory_space<vmem>>, vector<1x1xf32>
      tpu.vector_store %arg5[%c0_53, %c0_54], %85 {strides = array<i32>} : memref<1x1xf32, #tpu.memory_space<vmem>>, vector<1x1xf32>,
    } else {
    }
    return
  }
  func.func @transform_0(%arg0: i32) -> i32 {
    %c0_i32 = arith.constant 0 : i32
    %c0_i32_0 = arith.constant 0 : i32
    return %c0_i32 : i32
  }
  func.func @transform_1(%arg0: i32) -> i32 {
    %c0_i32 = arith.constant 0 : i32
    %c0_i32_0 = arith.constant 0 : i32
    return %c0_i32 : i32
  }
  func.func @transform_2(%arg0: i32) -> (i32, i32) {
    %c0_i32 = arith.constant 0 : i32
    %c0_i32_0 = arith.constant 0 : i32
    return %arg0, %c0_i32 : i32, i32
  }
  func.func @transform_3(%arg0: i32) -> (i32, i32) {
    %c0_i32 = arith.constant 0 : i32
    %c0_i32_0 = arith.constant 0 : i32
    return %arg0, %c0_i32 : i32, i32
  }
  func.func @transform_4(%arg0: i32) -> (i32, i32) {
    %c0_i32 = arith.constant 0 : i32
    %c0_i32_0 = arith.constant 0 : i32
    %c0_i32_1 = arith.constant 0 : i32
    return %c0_i32, %c0_i32_0 : i32, i32
  }
}

</mosaic_0001>

<bundles_post_ra>
// kernel: tpu_custom_call.1
= control target key start
LH: loop header
LB: loop body
LE: loop exit
PB: predicated region body
PF: predicated region fallthrough
CT: control target
= control target key end

     0   :  { %10 = vsyncpa [#allocation11], 0  ;;  %s466_s0 = inlined_call_operand.<no memory space> [shape: s32[1], index: 0, kind: input, shape index: {}]   ;;  %s467_s1 = inlined_call_operand.vmem [shape: f32[2], index: 1, kind: input, shape index: {}]   ;;  %s468_s2 = inlined_call_operand.hbm [shape: f32[8,128], index: 2, kind: input, shape index: {}]   ;;  %s469_s3 = inlined_call_operand.hbm [shape: f32[8,128], index: 3, kind: input, shape index: {}]   ;;  %s470_s4 = inlined_call_operand.hbm [shape: f32[1,1], index: 4, kind: output, shape index: {}]  }
   0x1   :  { %11 = vsyncpa [#allocation9], 0 }
   0x2   :  { %12 = vsyncpa [#allocation14], 0 }
   0x3   :  { %13 = vsyncpa [#allocation10], 0  ;;  %s21_s17 = sshll.u32 %s467_s1, 4  ;;  %s30_s20 = sshll.u32 %s468_s2, 4  ;;  %s22_s17 = int_to_ptr.vmem [resolvable:$true] %s21_s17  ;;  %s31_s20 = int_to_ptr.hbm [resolvable:$true] %s30_s20 }
   0x4   :  { %s411_s21 = smov [#allocation8]   ;;  %s412_s22 = smov [#allocation12]  }
   0x5   :  { %24 = dma.vmem_to_smem %s22_s17, 16, %s411_s21, [#allocation11]  }
   0x6   :  { %s32_s23 = sshll.u32 %s412_s22, 4  ;;  %s41_s26 = sshll.u32 %s469_s3, 4  ;;  %s33_s23 = int_to_ptr.vmem [resolvable:$true] %s32_s23  ;;  %s42_s26 = int_to_ptr.hbm [resolvable:$true] %s41_s26 }
   0x7   :  { %35 = dma.hbm_to_vmem [thread:$0]  %s31_s20, 128, %s33_s23, [#allocation9]  }
   0x8   :  { %s413_s27 = smov [#allocation13]  }
   0x9   :  { %s43_s28 = sshll.u32 %s413_s27, 4  ;;  %s44_s28 = int_to_ptr.vmem [resolvable:$true] %s43_s28 }
   0xa   :  { %46 = dma.hbm_to_vmem [thread:$0]  %s42_s26, 128, %s44_s28, [#allocation14]  }
   0xb   :  { %403 = dma.done.wait [#allocation11], 16  }
   0xc   :  { %404 = vsyncadd [#allocation11], 4294967280 }
   0xd   :  { %405 = dma.done.wait [#allocation9], 128  }
   0xe   :  { %406 = vsyncadd [#allocation9], 4294967168 }
   0xf   :  { %407 = dma.done.wait [#allocation14], 128  }
  0x10   :  { %408 = vsyncadd [#allocation14], 4294967168 }
  0x11   :  { %59 = sfence }
  0x12   :  { %s70_s1 = sld [smem:[#allocation8]]  ;;  %v69_v0 = vld [vmem:[#allocation12] sm:$0xff]  ;;  %v73_v1 = vld [vmem:[#allocation13] sm:$0xff]  ;;  %s104_s30 = scvt.s32.f32 %s466_s0  ;;  %vm265_vm12 = vcmask 0  }
  0x13   :  { %s286_s2 = sld [smem:[#allocation8 + $0x1]]  ;;  %s414_s18 = smov 0.0  }
  0x14   :  { %v156_v9 = vstv %s104_s30  ;;  %s415_s23 = smov 1e-12  }
  0x15   :  { %311 = vrcp.f32 %v156_v9  ;;  %vm162_vm0 = vweird.f32 %v156_v9  ;;  %v168_v38 = vand.u32 2147483648, %v156_v9  ;;  %v166_v42 = vand.u32 2147483647, %v156_v9 }
  0x17   :  { %v169_v47 = vor.u32 1.1754944e-38, %v168_v38  ;;  %vm167_vm3 = vcmp.eq.f32.partialorder %v166_v42, 8.507059e+37 }
  0x18   :  { %v71_v2 = vstv %s70_s1 }
  0x19   :  { %v72_v3 = vsub.f32 %v69_v0, %v71_v2  ;;  %v75_v4 = vstv %s286_s2  ;;  %s416_s2 = smov [#allocation15]  }
  0x1a   :  { %v76_v5 = vsub.f32 %v73_v1, %v75_v4  ;;  %s272_s3 = sshll.u32 %s416_s2, 4  ;;  %s273_s3 = int_to_ptr.vmem [resolvable:$true] %s272_s3 }
  0x1b   :  { %106 = vadd.xlane.f32.xlu0 %v72_v3  ;;  %v86_v6 = vmul.f32 %v72_v3, %v72_v3  ;;  %v312_v10 = vpop.eup %311 }
  0x1c   :  { %v96_v7 = vmul.f32 %v76_v5, %v72_v3  ;;  %v91_v8 = vmul.f32 %v76_v5, %v76_v5  ;;  %v158_v17 = vmul.f32 %v312_v10, %v156_v9  ;;  %vm163_vm1 = vweird.f32 %v312_v10 }
  0x1d   :  { %126 = vadd.xlane.f32.xlu1 %v86_v6  ;;  %vm164_vm2 = vmor %vm162_vm0, %vm163_vm1 }
  0x1e   :  { %146 = vadd.xlane.f32.xlu2 %v96_v7  ;;  %v159_v23 = vsub.f32 1.0, %v158_v17 }
  0x20   :  { %v160_v33 = vmul.f32 %v312_v10, %v159_v23 }
  0x22   :  { %v161_v41 = vadd.f32 %v312_v10, %v160_v33 }
  0x23   :  { %116 = vadd.xlane.f32.xlu0 %v76_v5 }
  0x24   :  { %v165_v50 = vsel %vm164_vm2, %v312_v10, %v161_v41 }
  0x25   :  { %136 = vadd.xlane.f32.xlu1 %v91_v8  ;;  %v170_v54 = vsel %vm167_vm3, %v169_v47, %v165_v50 }
  0x8e   :  { %v107_v11 = vpop.xlane.xlu0 %106 }
  0x8f   :  { %v108_v12 = vrot.slane %v107_v11, 4 }
  0x90   :  { %v127_v13 = vpop.xlane.xlu1 %126 }
  0x91   :  { %v109_v14 = vadd.f32 %v108_v12, %v107_v11  ;;  %v128_v15 = vrot.slane %v127_v13, 4  ;;  %v147_v16 = vpop.xlane.xlu2 %146 }
  0x92   :  { %v148_v18 = vrot.slane %v147_v16, 4 }
  0x93   :  { %v110_v19 = vrot.slane %v109_v14, 2  ;;  %v129_v20 = vadd.f32 %v128_v15, %v127_v13 }
  0x94   :  { %v149_v21 = vadd.f32 %v148_v18, %v147_v16 }
  0x95   :  { %v111_v22 = vadd.f32 %v110_v19, %v109_v14  ;;  %v130_v24 = vrot.slane %v129_v20, 2 }
  0x96   :  { %v117_v25 = vpop.xlane.xlu0 %116  ;;  %v150_v28 = vrot.slane %v149_v21, 2 }
  0x97   :  { %v118_v26 = vrot.slane %v117_v25, 4  ;;  %v112_v27 = vrot.slane %v111_v22, 1  ;;  %v131_v34 = vadd.f32 %v130_v24, %v129_v20 }
  0x98   :  { %v137_v29 = vpop.xlane.xlu1 %136  ;;  %v151_v37 = vadd.f32 %v150_v28, %v149_v21 }
  0x99   :  { %v119_v30 = vadd.f32 %v118_v26, %v117_v25  ;;  %v138_v31 = vrot.slane %v137_v29, 4  ;;  %v113_v32 = vadd.f32 %v112_v27, %v111_v22  ;;  %v132_v43 = vrot.slane %v131_v34, 1 }
  0x9a   :  { %v152_v46 = vrot.slane %v151_v37, 1 }
  0x9b   :  { %v120_v35 = vrot.slane %v119_v30, 2  ;;  %v139_v36 = vadd.f32 %v138_v31, %v137_v29  ;;  %287 = vpush %v113_v32  ;;  %v133_v51 = vadd.f32 %v132_v43, %v131_v34 }
  0x9c   :  { %v153_v53 = vadd.f32 %v152_v46, %v151_v37 }
  0x9d   :  { %v121_v39 = vadd.f32 %v120_v35, %v119_v30  ;;  %v140_v40 = vrot.slane %v139_v36, 2 }
  0x9f   :  { %v141_v44 = vadd.f32 %v140_v40, %v139_v36  ;;  %v122_v45 = vrot.slane %v121_v39, 1 }
  0xa1   :  { %v123_v48 = vadd.f32 %v122_v45, %v121_v39  ;;  %v142_v49 = vrot.slane %v141_v44, 1 }
  0xa3   :  { %289 = vpush %v123_v48  ;;  %v143_v52 = vadd.f32 %v142_v49, %v141_v44 }
  0xa4   :  { %291 = vpush %v133_v51 }
  0xa5   :  { %293 = vpush %v143_v52 }
  0xa6   :  { %295 = vpush %v153_v53 }
  0xa7   :  { %297 = vpush %v170_v54 }
  0xcc   :  { %s288_s0 = spop %287 }
  0xcd   :  { %s155_s10 = smul.f32 %s288_s0, %s288_s0 }
  0xd4   :  { %s290_s5 = spop %289 }
  0xd5   :  { %s174_s6 = smul.f32 %s290_s5, %s290_s5  ;;  %s292_s7 = spop %291 }
  0xd6   :  { %s193_s8 = smul.f32 %s290_s5, %s288_s0  ;;  %s294_s9 = spop %293 }
  0xd7   :  { %s454_s11 = spop %295  ;;  %s274_s5 = sshll.u32 %s470_s4, 4  ;;  %s275_s5 = int_to_ptr.hbm [resolvable:$true] %s274_s5 }
  0xd8   :  { %s298_s12 = spop %297 }
  0xd9   :  { %s172_s13 = smul.f32 %s298_s12, %s155_s10 }
  0xda   :  { %s191_s14 = smul.f32 %s298_s12, %s174_s6 }
  0xdb   :  { %s173_s15 = ssub.f32 %s292_s7, %s172_s13  ;;  %s456_s16 = smul.f32 %s298_s12, %s193_s8 }
  0xdc   :  { %s192_s17 = ssub.f32 %s294_s9, %s191_s14 }
  0xdd   :  { %s212_s19 = smax.f32 %s414_s18, %s173_s15  ;;  %s211_s20 = ssub.f32 %s454_s11, %s456_s16 }
  0xde   :  { %v213_v55 = vstv %s212_s19  ;;  %s228_s21 = smax.f32 %s414_s18, %s192_s17 }
  0xdf   :  { %313 = vrsqrt.f32 %v213_v55  ;;  %v229_v56 = vstv %s228_s21  ;;  %vm221_vm4 = vcmp.eq.f32.partialorder %v213_v55, inf  ;;  %v224_v6 = vand.u32 2147483648, %v213_v55 }
  0xe0   :  { %315 = vrsqrt.f32 %v229_v56  ;;  %vm223_vm5 = vcmp.eq.f32.partialorder %v213_v55, 0.0  ;;  %vm237_vm6 = vcmp.eq.f32.partialorder %v229_v56, inf  ;;  %v240_v9 = vand.u32 2147483648, %v229_v56 }
  0xe1   :  { %vm239_vm7 = vcmp.eq.f32.partialorder %v229_v56, 0.0 }
  0xe5   :  { %v314_v57 = vpop.eup %313 }
  0xe6   :  { %v316_v58 = vpop.eup %315  ;;  %v215_v59 = vmul.f32 %v314_v57, %v213_v55 }
  0xe7   :  { %v231_v60 = vmul.f32 %v316_v58, %v229_v56 }
  0xe8   :  { %v216_v61 = vmul.f32 %v314_v57, %v215_v59 }
  0xe9   :  { %v232_v62 = vmul.f32 %v316_v58, %v231_v60 }
  0xea   :  { %v217_v63 = vmul.f32 0.5, %v216_v61 }
  0xeb   :  { %v233_v0 = vmul.f32 0.5, %v232_v62 }
  0xec   :  { %v218_v1 = vsub.f32 1.5, %v217_v63 }
  0xed   :  { %v234_v2 = vsub.f32 1.5, %v233_v0 }
  0xee   :  { %v219_v3 = vmul.f32 %v314_v57, %v218_v1 }
  0xef   :  { %v235_v4 = vmul.f32 %v316_v58, %v234_v2 }
  0xf0   :  { %v220_v5 = vmul.f32 %v219_v3, %v213_v55 }
  0xf1   :  { %v236_v7 = vmul.f32 %v235_v4, %v229_v56 }
  0xf2   :  { %v222_v8 = vsel %vm221_vm4, %v213_v55, %v220_v5 }
  0xf3   :  { %v225_v10 = vsel %vm223_vm5, %v224_v6, %v222_v8  ;;  %v238_v11 = vsel %vm237_vm6, %v229_v56, %v236_v7 }
  0xf4   :  { %299 = vpush %v225_v10  ;;  %v241_v12 = vsel %vm239_vm7, %v240_v9, %v238_v11 }
  0xf5   :  { %301 = vpush %v241_v12 }
 0x125   :  { %s300_s22 = spop %299 }
 0x126   :  { %s227_s24 = smax.f32 %s415_s23, %s300_s22  ;;  %s302_s25 = spop %301 }
 0x127   :  { %s243_s26 = smax.f32 %s415_s23, %s302_s25 }
 0x128   :  { %s244_s27 = smul.f32 %s243_s26, %s227_s24 }
 0x12a   :  { %v245_v13 = vstv %s244_s27 }
 0x12b   :  { %317 = vrcp.f32 %v245_v13  ;;  %v257_v17 = vand.u32 2147483648, %v245_v13  ;;  %v255_v19 = vand.u32 2147483647, %v245_v13  ;;  %vm251_vm9 = vweird.f32 %v245_v13 }
 0x12d   :  { %v258_v21 = vor.u32 1.1754944e-38, %v257_v17  ;;  %vm256_vm11 = vcmp.eq.f32.partialorder %v255_v19, 8.507059e+37 }
 0x131   :  { %v318_v14 = vpop.eup %317 }
 0x132   :  { %v247_v15 = vmul.f32 %v318_v14, %v245_v13  ;;  %vm252_vm8 = vweird.f32 %v318_v14 }
 0x133   :  { %vm253_vm10 = vmor %vm251_vm9, %vm252_vm8 }
 0x134   :  { %v248_v16 = vsub.f32 1.0, %v247_v15 }
 0x136   :  { %v249_v18 = vmul.f32 %v318_v14, %v248_v16 }
 0x138   :  { %v250_v20 = vadd.f32 %v318_v14, %v249_v18 }
 0x13a   :  { %v254_v22 = vsel %vm253_vm10, %v318_v14, %v250_v20 }
 0x13b   :  { %v259_v23 = vsel %vm256_vm11, %v258_v21, %v254_v22 }
 0x13c   :  { %303 = vpush %v259_v23 }
 0x16d   :  { %s304_s28 = spop %303 }
 0x16e   :  { %s261_s1 = smul.f32 %s304_s28, %s211_s20 }
 0x170   :  { %s262_s29 = ssub.f32 1.0, %s261_s1 }
 0x172   :  { %s263_s6 = smul.f32 0.5, %s262_s29 }
 0x174   :  { %v264_v24 = vstv %s263_s6 }
 0x175   :  { %266 = vst.msk [vmem:[#allocation15] sm:$0x1] %vm265_vm12, %v264_v24 }
 0x176   :  { %277 = dma.vmem_to_hbm [thread:$0]  %s273_s3, 16, %s275_s5, [#allocation10]  }
 0x177   :  { %409 = dma.done.wait [#allocation10], 16  }
 0x178   :  { %410 = vsyncadd [#allocation10], 4294967280 }
 0x179   :  { %282 = vsyncpa [#allocation9], 1 }
 0x17a   :  { %283 = vsyncpa [#allocation14], 1 }
 0x17b   :  { %284 = vsyncpa [#allocation10], 1 }
 0x17c   :  { %285 = vsyncpa [#allocation11], 1 }

</bundles_post_ra>
